<compile_context>
chip_gen: v6e
topology: v6e:2x2x1
jax: 0.10.0
libtpu: 0.0.40
codegen_flags: <defaults>
</compile_context>

<pallas_src>
import functools

import jax
import jax.numpy as jnp
from jax.experimental import pallas as pl
from jax.experimental.pallas import tpu as pltpu

EPS = 1e-5


# ------------------------------ Pallas kernel ------------------------------ #

def _conv_bn_kernel(x_ref, w_ref, b_ref, *rest, taps, Hph, Ho, Wo,
                    apply_relu, has_residual):
    """Direct conv + folded-BN affine (+ residual) (+ ReLU) for one image.

    x_ref : (1, P*Hph, Wph, Cin) bf16  phase-split padded input (one image)
    w_ref : (kh*kw, Cin, Cout)   bf16  per-tap weights, BN scale folded in
    b_ref : (1, Cout)            f32   folded BN bias
    rest  : [r_ref (1, Ho*Wo, Cout)], o_ref (1, Ho*Wo, Cout)
    """
    if has_residual:
        r_ref, o_ref = rest
    else:
        (o_ref,) = rest

    cin = x_ref.shape[-1]
    cout = w_ref.shape[-1]

    acc = jnp.zeros((Ho * Wo, cout), jnp.float32)
    for t, (ph, r0, c0) in enumerate(taps):          # static unrolled taps
        patch = x_ref[0, ph * Hph + r0: ph * Hph + r0 + Ho, c0: c0 + Wo, :]
        patch = patch.reshape(Ho * Wo, cin)
        acc = acc + jnp.dot(patch, w_ref[t],
                            preferred_element_type=jnp.float32)

    y = acc + b_ref[...]                              # folded BN bias
    if has_residual:
        y = y + r_ref[0].astype(jnp.float32)          # fused residual add
    if apply_relu:
        y = jnp.maximum(y, 0.0)
    o_ref[0] = y.astype(o_ref.dtype)


# -------------------------------- JAX glue --------------------------------- #

def conv_bn_pallas(x_nhwc, w_oihw, bn, stride, padding, apply_relu,
                   residual=None):
    """Conv2d(bias=False, OIHW weights) + eval-mode BN (+ residual) (+ ReLU)."""
    out_dtype = x_nhwc.dtype
    cout, cin, kh, kw = (int(d) for d in w_oihw.shape)
    sh, sw = stride
    ph, pw = padding

    # A strided 1x1 conv is just a matmul on the spatially-subsampled input.
    if kh == 1 and kw == 1 and (sh > 1 or sw > 1):
        x_nhwc = x_nhwc[:, ::sh, ::sw, :]
        sh, sw = 1, 1

    N, H, W, _ = x_nhwc.shape
    Ho = (H + 2 * ph - kh) // sh + 1
    Wo = (W + 2 * pw - kw) // sw + 1

    # Fold eval-mode BN: per-channel scale goes into the weights, bias stays.
    gamma, beta, mean, var = bn
    scale = gamma / jnp.sqrt(var + EPS)
    bias = (beta - mean * scale).astype(jnp.float32).reshape(1, cout)

    # Per-tap weights (kh*kw, Cin, Cout), BN scale folded, bf16 for the MXU.
    w_taps = jnp.transpose(w_oihw, (2, 3, 1, 0)).reshape(kh * kw, cin, cout)
    w_taps = (w_taps * scale[None, None, :]).astype(jnp.bfloat16)

    # Pad and phase-split the input by the stride so every tap is a *static*
    # contiguous window of one phase (no strided reads, no im2col in HBM).
    xp = jnp.pad(x_nhwc, ((0, 0), (ph, ph), (pw, pw), (0, 0)))
    Hp, Wp = xp.shape[1], xp.shape[2]
    Hph, Wph = -(-Hp // sh), -(-Wp // sw)
    xp = jnp.pad(xp, ((0, 0), (0, Hph * sh - Hp), (0, Wph * sw - Wp), (0, 0)))
    xp = xp.reshape(N, Hph, sh, Wph, sw, cin).transpose(0, 2, 4, 1, 3, 5)
    xp = xp.reshape(N, sh * sw * Hph, Wph, cin).astype(jnp.bfloat16)

    # Tap (ki, kj) -> (phase index, phase-row offset, phase-col offset).
    taps = tuple(((ki % sh) * sw + (kj % sw), ki // sh, kj // sw)
                 for ki in range(kh) for kj in range(kw))

    kern = functools.partial(
        _conv_bn_kernel, taps=taps, Hph=Hph, Ho=Ho, Wo=Wo,
        apply_relu=apply_relu, has_residual=residual is not None)

    in_specs = [
        pl.BlockSpec((1, sh * sw * Hph, Wph, cin), lambda n: (n, 0, 0, 0)),
        pl.BlockSpec((kh * kw, cin, cout), lambda n: (0, 0, 0)),
        pl.BlockSpec((1, cout), lambda n: (0, 0)),
    ]
    args = [xp, w_taps, bias]
    if residual is not None:
        in_specs.append(pl.BlockSpec((1, Ho * Wo, cout), lambda n: (n, 0, 0)))
        args.append(residual.reshape(N, Ho * Wo, cout))

    out = pl.pallas_call(
        kern,
        out_shape=jax.ShapeDtypeStruct((N, Ho * Wo, cout), out_dtype),
        grid=(N,),
        in_specs=in_specs,
        out_specs=pl.BlockSpec((1, Ho * Wo, cout), lambda n: (n, 0, 0)),
        compiler_params=pltpu.CompilerParams(
            dimension_semantics=("parallel",),
            vmem_limit_bytes=64 * 1024 * 1024),
    )(*args)
    return out.reshape(N, Ho, Wo, cout)


# ------------------------------ Block module -------------------------------- #

def init_block_params(key, in_planes, planes, stride):
    expansion = 1
    ks = jax.random.split(key, 6)

    def conv_w(k, c_out, c_in, kh, kw):
        fan_in = c_in * kh * kw
        return jax.random.normal(k, (c_out, c_in, kh, kw),
                                 jnp.float32) / jnp.sqrt(fan_in)

    def bn_params(k, c):
        k1, k2, k3 = jax.random.split(k, 3)
        gamma = 1.0 + 0.1 * jax.random.normal(k1, (c,), jnp.float32)
        beta = 0.1 * jax.random.normal(k2, (c,), jnp.float32)
        mean = 0.1 * jax.random.normal(k3, (c,), jnp.float32)
        var = jnp.ones((c,), jnp.float32)
        return (gamma, beta, mean, var)

    params = {
        # `self.net` body (BasicBlock): conv3x3(stride)-BN-ReLU-conv3x3-BN
        "conv1_w": conv_w(ks[0], planes, in_planes, 3, 3),
        "bn1": bn_params(ks[1], planes),
        "conv2_w": conv_w(ks[2], planes, planes, 3, 3),
        "bn2": bn_params(ks[3], planes),
    }
    if stride[0] > 1 or stride[1] > 1 or in_planes != planes * expansion:
        params["down_w"] = conv_w(ks[4], planes * expansion, in_planes, 1, 1)
        params["down_bn"] = bn_params(ks[5], planes * expansion)
    return params


def block_forward(params, x_nchw, stride):
    # NCHW in / NCHW out; NHWC internally.
    x = jnp.transpose(x_nchw, (0, 2, 3, 1))

    # Residual branch (downsample if present).
    if "down_w" in params:
        r = conv_bn_pallas(x, params["down_w"], params["down_bn"],
                           stride, (0, 0), apply_relu=False)
    else:
        r = x

    # Main branch (self.net): conv1-BN-ReLU, then conv2-BN with the residual
    # add + final ReLU fused into its epilogue.
    h = conv_bn_pallas(x, params["conv1_w"], params["bn1"],
                       stride, (1, 1), apply_relu=True)
    out = conv_bn_pallas(h, params["conv2_w"], params["bn2"],
                         (1, 1), (1, 1), apply_relu=True, residual=r)

    # TODO(synk): self.subnetwork (`sub`) is None here; if supplied it would be
    # applied to the main-branch output before the residual add (which would
    # then have to be un-fused from conv2's epilogue).
    return jnp.transpose(out, (0, 3, 1, 2))


# ------------------------------- Reference ---------------------------------- #

def _ref_conv_bn(x_nchw, w, bn, stride, padding, relu):
    y = jax.lax.conv_general_dilated(
        x_nchw, w, window_strides=stride,
        padding=[(padding[0], padding[0]), (padding[1], padding[1])],
        dimension_numbers=("NCHW", "OIHW", "NCHW"))
    gamma, beta, mean, var = bn
    scale = (gamma / jnp.sqrt(var + EPS)).reshape(1, -1, 1, 1)
    bias = (beta - mean * gamma / jnp.sqrt(var + EPS)).reshape(1, -1, 1, 1)
    y = y * scale + bias
    return jnp.maximum(y, 0.0) if relu else y


if __name__ == "__main__":
    key = jax.random.PRNGKey(0)
    kx, kp = jax.random.split(key)

    N, Cin, H, W = 2, 4, 16, 16
    planes = 8
    stride = (2, 2)   # -> downsample path is active (stride > 1, Cin != planes)

    x = jax.random.normal(kx, (N, Cin, H, W), jnp.float32)
    params = init_block_params(kp, Cin, planes, stride)

    out = block_forward(params, x, stride)
    out = jax.block_until_ready(out)

    # Pure-JAX f32 reference of the same forward pass.
    r = _ref_conv_bn(x, params["down_w"], params["down_bn"], stride, (0, 0), False)
    h = _ref_conv_bn(x, params["conv1_w"], params["bn1"], stride, (1, 1), True)
    h = _ref_conv_bn(h, params["conv2_w"], params["bn2"], (1, 1), (1, 1), False)
    ref = jnp.maximum(r + h, 0.0)

    assert out.shape == (N, planes, H // 2, W // 2), out.shape
    # bf16 matmuls with f32 accumulation -> loosened tolerance vs. f32 reference.
    max_err = float(jnp.max(jnp.abs(out - ref)))
    assert jnp.allclose(out, ref, atol=5e-2, rtol=5e-2), max_err
    print("KERNEL_OK")
</pallas_src>

<mosaic_0001>
module attributes {stable_mosaic.version = 11 : i64} {
  func.func @_conv_bn_kernel(%arg0: i32, %arg1: memref<1x8x8x4xbf16, #tpu.memory_space<vmem>>, %arg2: memref<1x4x8xbf16, #tpu.memory_space<vmem>>, %arg3: memref<1x8xf32, #tpu.memory_space<vmem>>, %arg4: memref<1x64x8xf32, #tpu.memory_space<vmem>>) attributes {dimension_semantics = [#tpu.dimension_semantics<parallel>], iteration_bounds = array<i64: 2>, scalar_prefetch = 0 : i64, scratch_operands = 0 : i64, tpu.core_type = #tpu.core_type<tc>, window_params = [{transform_indices = @transform_0, window_bounds = array<i64: 1, 8, 8, 4>}, {pipeline_mode = #tpu.pipeline_mode<synchronous>, transform_indices = @transform_1, window_bounds = array<i64: 1, 4, 8>}, {pipeline_mode = #tpu.pipeline_mode<synchronous>, transform_indices = @transform_2, window_bounds = array<i64: 1, 8>}, {transform_indices = @transform_3, window_bounds = array<i64: 1, 64, 8>}]} {
    %cst = arith.constant 0.000000e+00 : f32
    %0 = vector.broadcast %cst : f32 to vector<64x8xf32>
    %c0 = arith.constant 0 : index
    %c0_0 = arith.constant 0 : index
    %c0_1 = arith.constant 0 : index
    %c0_2 = arith.constant 0 : index
    %1 = vector.load %arg1[%c0, %c0_0, %c0_1, %c0_2] : memref<1x8x8x4xbf16, #tpu.memory_space<vmem>>, vector<1x8x8x4xbf16>
    %2 = vector.shape_cast %1 : vector<1x8x8x4xbf16> to vector<8x8x4xbf16>
    %3 = vector.shape_cast %2 : vector<8x8x4xbf16> to vector<64x4xbf16>
    %c0_3 = arith.constant 0 : index
    %c0_4 = arith.constant 0 : index
    %c0_5 = arith.constant 0 : index
    %4 = vector.load %arg2[%c0_3, %c0_4, %c0_5] : memref<1x4x8xbf16, #tpu.memory_space<vmem>>, vector<1x4x8xbf16>
    %5 = vector.shape_cast %4 : vector<1x4x8xbf16> to vector<4x8xbf16>
    %cst_6 = arith.constant dense<0.000000e+00> : vector<64x8xf32>
    %6 = tpu.matmul %3, %5, %cst_6 {dimension_numbers = #tpu.dot_dimension_numbers<[1], [0], [0], [1], [0, 0, 1, 1], [], []>} : vector<64x4xbf16>, vector<4x8xbf16>, vector<64x8xf32> -> vector<64x8xf32>
    %7 = arith.addf %0, %6 : vector<64x8xf32>
    %c0_7 = arith.constant 0 : index
    %c0_8 = arith.constant 0 : index
    %8 = vector.load %arg3[%c0_7, %c0_8] : memref<1x8xf32, #tpu.memory_space<vmem>>, vector<1x8xf32>
    %9 = vector.broadcast %8 : vector<1x8xf32> to vector<64x8xf32>
    %10 = arith.addf %7, %9 : vector<64x8xf32>
    %c0_9 = arith.constant 0 : index
    %c0_10 = arith.constant 0 : index
    %c0_11 = arith.constant 0 : index
    %11 = vector.load %arg4[%c0_9, %c0_10, %c0_11] : memref<1x64x8xf32, #tpu.memory_space<vmem>>, vector<1x64x8xf32>
    %12 = vector.shape_cast %11 : vector<1x64x8xf32> to vector<64x8xf32>
    %13 = vector.shape_cast %10 : vector<64x8xf32> to vector<1x64x8xf32>
    tpu.vector_store %arg4[%c0_9, %c0_10, %c0_11], %13 {strides = array<i32>} : memref<1x64x8xf32, #tpu.memory_space<vmem>>, vector<1x64x8xf32>,
    return
  }
  func.func @transform_0(%arg0: i32) -> (i32, i32, i32, i32) {
    %c0_i32 = arith.constant 0 : i32
    %c0_i32_0 = arith.constant 0 : i32
    %c0_i32_1 = arith.constant 0 : i32
    %c0_i32_2 = arith.constant 0 : i32
    return %arg0, %c0_i32, %c0_i32_0, %c0_i32_1 : i32, i32, i32, i32
  }
  func.func @transform_1(%arg0: i32) -> (i32, i32, i32) {
    %c0_i32 = arith.constant 0 : i32
    %c0_i32_0 = arith.constant 0 : i32
    %c0_i32_1 = arith.constant 0 : i32
    %c0_i32_2 = arith.constant 0 : i32
    return %c0_i32, %c0_i32_0, %c0_i32_1 : i32, i32, i32
  }
  func.func @transform_2(%arg0: i32) -> (i32, i32) {
    %c0_i32 = arith.constant 0 : i32
    %c0_i32_0 = arith.constant 0 : i32
    %c0_i32_1 = arith.constant 0 : i32
    return %c0_i32, %c0_i32_0 : i32, i32
  }
  func.func @transform_3(%arg0: i32) -> (i32, i32, i32) {
    %c0_i32 = arith.constant 0 : i32
    %c0_i32_0 = arith.constant 0 : i32
    %c0_i32_1 = arith.constant 0 : i32
    return %arg0, %c0_i32, %c0_i32_0 : i32, i32, i32
  }
}

</mosaic_0001>

<bundles_post_ra>
// kernel: tpu_custom_call.1
= control target key start
LH: loop header
LB: loop body
LE: loop exit
PB: predicated region body
PF: predicated region fallthrough
CT: control target
= control target key end

     0   :  { %s435_s12 = smov 0   ;;  %s466_s0 = inlined_call_operand.vmem [shape: bf16[2,8,8,4], index: 0, kind: input, shape index: {}]   ;;  %s467_s1 = inlined_call_operand.vmem [shape: bf16[1,4,8], index: 1, kind: input, shape index: {}]   ;;  %s468_s2 = inlined_call_operand.vmem [shape: f32[1,8], index: 2, kind: input, shape index: {}]   ;;  %s469_s3 = inlined_call_operand.vmem [shape: f32[2,64,8], index: 3, kind: output, shape index: {}]  }
   0x1 LB: > { %s354_s13 = sadd.s32 4294967295, %s413_s12   ;;  %p358_p0 = scmp.ge.s32.totalorder %s413_s12, 1  ;;  %s413_s12 = sphi %s435_s12, %s13_s12  }
   0x2   : > { %p137_p1 = scmp.lt.s32.totalorder %s413_s12, 3 }
   0x4   : > { %p138_p2 = pnand %p358_p0, %p137_p1 }
   0x5   : > { %p161_p3 = scmp.lt.s32.totalorder (!%p138_p2), %s354_s13, 1 }
   0x6   : > { %141 = sbr.rel (%p138_p2) target bundleno = 218 (0xda), region = 32 }
   0xb   : > { %v180_v0 = vld [vmem:[%s467_s1] sm:$0x3]  ;;  %vm221_vm0 = vcmask 1041408   ;;  %s471_s13 = smov (!%p161_p3, %s354_s13), 1  ;;  %vm208_vm1 = vcmask 31744   ;;  %vm290_vm2 = vcmask 64512  }
   0xc   : > { %393 = vmatprep.subr.msk.bf16.mxu0 %vm221_vm0, %v180_v0  ;;  %394 = vmatprep.subr.msk.bf16.mxu1 %vm221_vm0, %v180_v0  ;;  %v223_v1 = vsel %vm221_vm0, %v180_v0, 0  ;;  %s374_s16 = sshll.u32 %s471_s13, 5  ;;  %s375_s20 = sshll.u32 %s471_s13, 6  ;;  %v363_v6 = vld [vmem:[%s468_s2] ss:$0 sm:$0xff] }
   0xd   : > { %382 = vmatpush3.bf16.msra.mxu0 %v223_v1  ;;  %392 = vmatpush3.bf16.msra.mxu1 %v223_v1  ;;  %s165_s19 = scalar_lea.vmem %s466_s0, %s374_s16  ;;  %s170_s25 = scalar_lea.vmem %s469_s3, %s375_s20 }
   0xe   : > { %v403_v2 = vld [vmem:[%s165_s19] sm:$0xff]   ;;  %v404_v3 = vld [vmem:[%s165_s19 + $0x10] sm:$0xff]   ;;  %v405_v4 = vld [vmem:[%s165_s19 + $0x8] sm:$0xff]  }
   0xf   : > { %383 = vmatprep.mubr.msk.bf16.mxu0 %vm208_vm1, %v403_v2  ;;  %387 = vmatprep.mubr.msk.bf16.mxu1 %vm208_vm1, %v404_v3  ;;  %v406_v5 = vld [vmem:[%s165_s19 + $0x18] sm:$0xff]  }
  0x10   : > { %384 = vmatmul.mubr.msk.bf16.vlgmr.msra.gmra.mxu0 %vm208_vm1, %v405_v4  ;;  %388 = vmatmul.mubr.msk.bf16.vlgmr.msra.gmra.mxu1 %vm208_vm1, %v406_v5 }
  0xd0   : > { %v385_v7 = vpop.f32.mrf.mxu0  ;;  %v389_v9 = vpop.f32.mrf.mxu1 }
  0xd1   : > { %v268_v8 = vadd.f32 %v385_v7, %v363_v6  ;;  %v284_v10 = vadd.f32 %v389_v9, %v363_v6 }
  0xd2   : > { %v259_v11 = vpop.f32.mrf.mxu0  ;;  %v275_v13 = vpop.f32.mrf.mxu1 }
  0xd3   : > { %293 = vst.msk [vmem:[%s170_s25 + $0x10] sm:$0xff] %vm290_vm2, %v268_v8  ;;  %v260_v12 = vadd.f32 %v363_v6, %v259_v11  ;;  %297 = vst.msk [vmem:[%s170_s25 + $0x30] sm:$0xff] %vm290_vm2, %v284_v10  ;;  %v276_v14 = vadd.f32 %v363_v6, %v275_v13 }
  0xd4   : > { %v386_v15 = vpop.f32.mrf.mxu0  ;;  %v390_v17 = vpop.f32.mrf.mxu1 }
  0xd5   : > { %291 = vst.msk [vmem:[%s170_s25] sm:$0xff] %vm290_vm2, %v260_v12  ;;  %v271_v16 = vadd.f32 %v386_v15, %v363_v6  ;;  %295 = vst.msk [vmem:[%s170_s25 + $0x20] sm:$0xff] %vm290_vm2, %v276_v14  ;;  %v287_v18 = vadd.f32 %v390_v17, %v363_v6 }
  0xd6   : > { %v262_v19 = vpop.f32.mrf.mxu0  ;;  %v278_v21 = vpop.f32.mrf.mxu1 }
  0xd7   : > { %294 = vst.msk [vmem:[%s170_s25 + $0x18] sm:$0xff] %vm290_vm2, %v271_v16  ;;  %v263_v20 = vadd.f32 %v363_v6, %v262_v19  ;;  %298 = vst.msk [vmem:[%s170_s25 + $0x38] sm:$0xff] %vm290_vm2, %v287_v18  ;;  %v279_v22 = vadd.f32 %v363_v6, %v278_v21 }
  0xd9   : > { %292 = vst.msk [vmem:[%s170_s25 + $0x8] sm:$0xff] %vm290_vm2, %v263_v20  ;;  %296 = vst.msk [vmem:[%s170_s25 + $0x28] sm:$0xff] %vm290_vm2, %v279_v22 }
  0xda PF: > { %s13_s12 = sadd.s32 1, %s413_s12  }
  0xdb   : > { %p10_p4 = scmp.ge.s32.totalorder %s13_s12, 4  }
  0xdd   :  { %12 = sbr.rel (!%p10_p4) target bundleno = 1 (0x1), region = 62 }

</bundles_post_ra>
